<compile_context>
chip_gen: v6e
topology: v6e:2x2x1
jax: 0.10.0
libtpu: 0.0.40
codegen_flags: <defaults>
</compile_context>

<pallas_src>
import functools

import jax
import jax.numpy as jnp
from jax import lax
from jax.experimental import pallas as pl
from jax.experimental.pallas import tpu as pltpu


def _pn_loss_kernel(x_ref, o_ref, g_acc, gram_acc, *, n_ways, n_supports, n_queries, w):
    # x_ref    : (batch, feat_block) VMEM tile, batch = n_ways*(n_supports+n_queries)
    # o_ref    : (3,) SMEM -> [w*loss, loss, acc]
    # g_acc    : (batch, n_ways)  f32 VMEM accumulator of q.p contributions
    # gram_acc : (n_ways, n_ways) f32 VMEM accumulator of proto @ proto^T (diag = ||p||^2)
    j = pl.program_id(0)
    nb = pl.num_programs(0)
    k = n_supports + n_queries
    batch = n_ways * k
    n_q_total = n_ways * n_queries

    @pl.when(j == 0)
    def _init():
        g_acc[...] = jnp.zeros_like(g_acc)
        gram_acc[...] = jnp.zeros_like(gram_acc)

    # Prototypes for this feature chunk: strided sublane gather of the support rows
    # (rows s, s+k, s+2k, ...).  Mean accumulated in f32 only when n_supports > 1.
    if n_supports == 1:
        proto = x_ref[pl.ds(0, n_ways, stride=k), :]                  # (n_ways, fb), native dtype
    else:
        acc = x_ref[pl.ds(0, n_ways, stride=k), :].astype(jnp.float32)
        for s in range(1, n_supports):
            acc = acc + x_ref[pl.ds(s, n_ways, stride=k), :].astype(jnp.float32)
        proto = (acc * jnp.float32(1.0 / n_supports)).astype(x_ref.dtype)

    dims = (((1,), (1,)), ((), ()))
    # One MXU push for ALL batch rows (support rows included; masked in the epilogue).
    g = lax.dot_general(x_ref[...], proto, dims, preferred_element_type=jnp.float32)
    g_acc[...] = g_acc[...] + g                                        # (batch, n_ways)
    # Prototype Gram chunk contribution; its diagonal accumulates ||p_c||^2.
    gram_acc[...] = gram_acc[...] + lax.dot_general(
        proto, proto, dims, preferred_element_type=jnp.float32)        # (n_ways, n_ways)

    # Finalize (cross-entropy + accuracy) only once, on the last feature chunk.
    @pl.when(j == nb - 1)
    def _finalize():
        # ||p_c||^2 as a row vector via a masked sublane reduce of the Gram diagonal.
        r5 = lax.broadcasted_iota(jnp.int32, (n_ways, n_ways), 0)
        c5 = lax.broadcasted_iota(jnp.int32, (n_ways, n_ways), 1)
        pp_row = jnp.sum(jnp.where(r5 == c5, gram_acc[...], 0.0),
                         axis=0, keepdims=True)                        # (1, n_ways)

        # True logits are -(||q||^2 - 2 q.p + ||p||^2); the per-row ||q||^2 constant is
        # dropped (softmax CE / argmax invariant) -- these are NOT distances.
        logits = 2.0 * g_acc[...] - pp_row                             # (batch, n_ways)

        row = lax.broadcasted_iota(jnp.int32, (batch, n_ways), 0)
        col = lax.broadcasted_iota(jnp.int32, (batch, n_ways), 1)
        # way = row // k via exact f32 floor (+0.5 guard); exact for realistic sizes.
        way = jnp.floor((row.astype(jnp.float32) + 0.5)
                        * jnp.float32(1.0 / k)).astype(jnp.int32)
        rem = row - way * k
        is_query = (rem >= n_supports)[:, :1]                          # (batch, 1) bool
        label = way                                                    # (batch, n_ways)

        m = jnp.max(logits, axis=-1, keepdims=True)
        lse = m + jnp.log(jnp.sum(jnp.exp(logits - m), axis=-1, keepdims=True))
        correct_logit = jnp.sum(jnp.where(col == label, logits, 0.0),
                                axis=-1, keepdims=True)                # (batch, 1)
        per_row = lse - correct_logit
        loss_sum = jnp.sum(jnp.where(is_query, per_row, 0.0))

        # argmax with first-occurrence tie-break (matches torch/jnp argmax).
        pred = jnp.min(jnp.where(logits >= m, col, n_ways),
                       axis=-1, keepdims=True)                         # (batch, 1)
        hit = jnp.logical_and(is_query, pred == label[:, :1])
        acc_sum = jnp.sum(jnp.where(hit, 1.0, 0.0))

        inv_nq = jnp.float32(1.0 / n_q_total)
        raw = loss_sum * inv_nq
        o_ref[0] = raw * jnp.float32(w)   # scaled loss fused into the kernel epilogue
        o_ref[1] = raw
        o_ref[2] = acc_sum * inv_nq


def _pick_feat_block(batch, feat, itemsize, budget_bytes=16 << 20):
    """Largest feature block whose double-buffered tile fits the VMEM budget."""
    if 2 * batch * feat * itemsize <= budget_bytes:
        return feat                                   # single full-feature block
    fb = (budget_bytes // (2 * batch * itemsize)) // 128 * 128
    return max(128, min(int(fb), feat))


def pn_loss(features, labels=None, *, n_supports=1, n_queries=15, n_ways=5, w=1.0):
    """Returns (w*loss, {'PNLoss': loss, 'Acc': acc}) like the PyTorch module.

    `labels` is accepted for signature parity but ignored -- the PyTorch forward
    overwrites it with arange labels anyway.
    """
    del labels
    batch, feat = features.shape
    k = n_supports + n_queries
    assert batch == n_ways * k, (batch, n_ways, k)

    itemsize = jnp.dtype(features.dtype).itemsize
    feat_block = _pick_feat_block(batch, feat, itemsize)
    if feat % feat_block != 0:
        # Zero-pad the tail: zeros contribute nothing to q.p or ||p||^2 (exact).
        pad = feat_block - (feat % feat_block)
        features = jnp.pad(features, ((0, 0), (0, pad)))
        feat_padded = feat + pad
    else:
        feat_padded = feat
    nblocks = feat_padded // feat_block
    n_q_total = n_ways * n_queries

    kernel = functools.partial(_pn_loss_kernel, n_ways=n_ways,
                               n_supports=n_supports, n_queries=n_queries, w=w)

    cost = pl.CostEstimate(
        flops=2 * batch * n_ways * feat + 2 * n_ways * n_ways * feat + 8 * batch * n_ways,
        transcendentals=batch * (n_ways + 1),
        bytes_accessed=batch * feat * itemsize + 3 * 4,
    )

    out = pl.pallas_call(
        kernel,
        out_shape=jax.ShapeDtypeStruct((3,), jnp.float32),
        grid_spec=pltpu.PrefetchScalarGridSpec(
            num_scalar_prefetch=0,
            grid=(nblocks,),
            in_specs=[pl.BlockSpec((batch, feat_block), lambda j: (0, j))],
            out_specs=pl.BlockSpec(memory_space=pltpu.MemorySpace.SMEM),
            scratch_shapes=[pltpu.VMEM((batch, n_ways), jnp.float32),
                            pltpu.VMEM((n_ways, n_ways), jnp.float32)],
        ),
        compiler_params=pltpu.CompilerParams(
            dimension_semantics=("arbitrary",),
            vmem_limit_bytes=32 << 20,   # safe on v5e/v6e (128 MiB) and v7x (64 MiB)
        ),
        cost_estimate=cost,
    )(features)

    scaled, raw, acc = out[0], out[1], out[2]
    return scaled, {"PNLoss": raw, "Acc": acc}


def _reference(features, *, n_supports, n_queries, n_ways, w):
    feat = features.shape[1]
    f3 = features.reshape(n_ways, n_supports + n_queries, feat)
    supports = f3[:, :n_supports, :]
    queries = f3[:, n_supports:, :].reshape(n_ways * n_queries, feat)
    protos = supports.mean(axis=1)
    d = jnp.sum((queries[:, None, :] - protos[None, :, :]) ** 2, axis=-1)
    logits = -d
    labels = jnp.repeat(jnp.arange(n_ways), n_queries)
    logp = jax.nn.log_softmax(logits, axis=-1)
    loss = -jnp.mean(logp[jnp.arange(labels.shape[0]), labels])
    acc = jnp.mean((jnp.argmax(logits, axis=-1) == labels).astype(jnp.float32))
    return w * loss, loss, acc


if __name__ == "__main__":
    N_WAYS, N_SUPPORTS, N_QUERIES = 5, 1, 15     # module defaults -> batch = 80
    FEAT = 128
    W = 0.5
    BATCH = N_WAYS * (N_SUPPORTS + N_QUERIES)

    key = jax.random.PRNGKey(0)
    features = 0.2 * jax.random.normal(key, (BATCH, FEAT), dtype=jnp.float32)

    scaled, log = pn_loss(features, None, n_supports=N_SUPPORTS,
                          n_queries=N_QUERIES, n_ways=N_WAYS, w=W)
    scaled = jax.block_until_ready(scaled)
    raw = jax.block_until_ready(log["PNLoss"])
    acc = jax.block_until_ready(log["Acc"])

    ref_scaled, ref_raw, ref_acc = _reference(
        features, n_supports=N_SUPPORTS, n_queries=N_QUERIES, n_ways=N_WAYS, w=W)
    ref_scaled = jax.block_until_ready(ref_scaled)

    assert abs(float(scaled) - float(ref_scaled)) < 2e-3, (float(scaled), float(ref_scaled))
    assert abs(float(raw) - float(ref_raw)) < 2e-3, (float(raw), float(ref_raw))
    assert abs(float(acc) - float(ref_acc)) < 1e-6, (float(acc), float(ref_acc))
    print("KERNEL_OK")
</pallas_src>

<mosaic_0001>
module attributes {stable_mosaic.version = 11 : i64} {
  func.func @_pn_loss_kernel(%arg0: i32, %arg1: memref<80x128xf32, #tpu.memory_space<vmem>>, %arg2: memref<3xf32, #tpu.memory_space<smem>>, %arg3: memref<80x5xf32, #tpu.memory_space<vmem>>, %arg4: memref<5x5xf32, #tpu.memory_space<vmem>>) attributes {dimension_semantics = [#tpu.dimension_semantics<arbitrary>], iteration_bounds = array<i64: 1>, scalar_prefetch = 0 : i64, scratch_operands = 2 : i64, tpu.core_type = #tpu.core_type<tc>, window_params = [{transform_indices = @transform_0, window_bounds = array<i64: 80, 128>}, {transform_indices = @transform_1, window_bounds = array<i64: 3>}]} {
    %c0_i32 = arith.constant 0 : i32
    %0 = arith.cmpi eq, %arg0, %c0_i32 : i32
    %1 = arith.extui %0 : i1 to i32
    %c0_i32_0 = arith.constant 0 : i32
    %2 = arith.cmpi ne, %1, %c0_i32_0 : i32
    scf.if %2 {
      %cst_15 = arith.constant 0.000000e+00 : f32
      %16 = vector.broadcast %cst_15 : f32 to vector<80x5xf32>
      %c0_16 = arith.constant 0 : index
      %c0_17 = arith.constant 0 : index
      %17 = vector.load %arg3[%c0_16, %c0_17] : memref<80x5xf32, #tpu.memory_space<vmem>>, vector<80x5xf32>
      tpu.vector_store %arg3[%c0_16, %c0_17], %16 {strides = array<i32>} : memref<80x5xf32, #tpu.memory_space<vmem>>, vector<80x5xf32>,
      %cst_18 = arith.constant 0.000000e+00 : f32
      %18 = vector.broadcast %cst_18 : f32 to vector<5x5xf32>
      %c0_19 = arith.constant 0 : index
      %c0_20 = arith.constant 0 : index
      %19 = vector.load %arg4[%c0_19, %c0_20] : memref<5x5xf32, #tpu.memory_space<vmem>>, vector<5x5xf32>
      tpu.vector_store %arg4[%c0_19, %c0_20], %18 {strides = array<i32>} : memref<5x5xf32, #tpu.memory_space<vmem>>, vector<5x5xf32>,
    } else {
    }
    %c0 = arith.constant 0 : index
    %c0_1 = arith.constant 0 : index
    %3 = tpu.strided_load %arg1[%c0, %c0_1] {strides = array<i32: 16, 1>} : memref<80x128xf32, #tpu.memory_space<vmem>>, vector<5x128xf32>
    %c0_2 = arith.constant 0 : index
    %c0_3 = arith.constant 0 : index
    %4 = vector.load %arg1[%c0_2, %c0_3] : memref<80x128xf32, #tpu.memory_space<vmem>>, vector<80x128xf32>
    %cst = arith.constant dense<0.000000e+00> : vector<80x5xf32>
    %5 = tpu.matmul %4, %3, %cst {dimension_numbers = #tpu.dot_dimension_numbers<[1], [1], [0], [0], [0, 0, 1, 0], [], []>} : vector<80x128xf32>, vector<5x128xf32>, vector<80x5xf32> -> vector<80x5xf32>
    %c0_4 = arith.constant 0 : index
    %c0_5 = arith.constant 0 : index
    %6 = vector.load %arg3[%c0_4, %c0_5] : memref<80x5xf32, #tpu.memory_space<vmem>>, vector<80x5xf32>
    %7 = arith.addf %6, %5 : vector<80x5xf32>
    %c0_6 = arith.constant 0 : index
    %c0_7 = arith.constant 0 : index
    %8 = vector.load %arg3[%c0_6, %c0_7] : memref<80x5xf32, #tpu.memory_space<vmem>>, vector<80x5xf32>
    tpu.vector_store %arg3[%c0_6, %c0_7], %7 {strides = array<i32>} : memref<80x5xf32, #tpu.memory_space<vmem>>, vector<80x5xf32>,
    %c0_8 = arith.constant 0 : index
    %c0_9 = arith.constant 0 : index
    %9 = vector.load %arg4[%c0_8, %c0_9] : memref<5x5xf32, #tpu.memory_space<vmem>>, vector<5x5xf32>
    %cst_10 = arith.constant dense<0.000000e+00> : vector<5x5xf32>
    %10 = tpu.matmul %3, %3, %cst_10 {dimension_numbers = #tpu.dot_dimension_numbers<[1], [1], [0], [0], [0, 0, 1, 0], [], []>} : vector<5x128xf32>, vector<5x128xf32>, vector<5x5xf32> -> vector<5x5xf32>
    %11 = arith.addf %9, %10 : vector<5x5xf32>
    %c0_11 = arith.constant 0 : index
    %c0_12 = arith.constant 0 : index
    %12 = vector.load %arg4[%c0_11, %c0_12] : memref<5x5xf32, #tpu.memory_space<vmem>>, vector<5x5xf32>
    tpu.vector_store %arg4[%c0_11, %c0_12], %11 {strides = array<i32>} : memref<5x5xf32, #tpu.memory_space<vmem>>, vector<5x5xf32>,
    %c0_i32_13 = arith.constant 0 : i32
    %13 = arith.cmpi eq, %arg0, %c0_i32_13 : i32
    %14 = arith.extui %13 : i1 to i32
    %c0_i32_14 = arith.constant 0 : i32
    %15 = arith.cmpi ne, %14, %c0_i32_14 : i32
    scf.if %15 {
      %16 = tpu.iota {dimensions = array<i32: 0>} : vector<5x5xi32>
      %17 = tpu.iota {dimensions = array<i32: 1>} : vector<5x5xi32>
      %18 = arith.cmpi eq, %16, %17 : vector<5x5xi32>
      %c0_15 = arith.constant 0 : index
      %c0_16 = arith.constant 0 : index
      %19 = vector.load %arg4[%c0_15, %c0_16] : memref<5x5xf32, #tpu.memory_space<vmem>>, vector<5x5xf32>
      %cst_17 = arith.constant 0.000000e+00 : f32
      %20 = vector.broadcast %cst_17 : f32 to vector<5x5xf32>
      %21 = arith.select %18, %19, %20 : vector<5x5xi1>, vector<5x5xf32>
      %cst_18 = arith.constant dense<0.000000e+00> : vector<5xf32>
      %22 = vector.multi_reduction <add>, %21, %cst_18 [0] : vector<5x5xf32> to vector<5xf32>
      %23 = vector.shape_cast %22 : vector<5xf32> to vector<1x5xf32>
      %c0_19 = arith.constant 0 : index
      %c0_20 = arith.constant 0 : index
      %24 = vector.load %arg3[%c0_19, %c0_20] : memref<80x5xf32, #tpu.memory_space<vmem>>, vector<80x5xf32>
      %cst_21 = arith.constant 2.000000e+00 : f32
      %25 = vector.broadcast %cst_21 : f32 to vector<80x5xf32>
      %26 = arith.mulf %25, %24 : vector<80x5xf32>
      %27 = vector.broadcast %23 : vector<1x5xf32> to vector<80x5xf32>
      %28 = arith.subf %26, %27 : vector<80x5xf32>
      %29 = tpu.iota {dimensions = array<i32: 0>} : vector<80x5xi32>
      %30 = tpu.iota {dimensions = array<i32: 1>} : vector<80x5xi32>
      %31 = arith.sitofp %29 : vector<80x5xi32> to vector<80x5xf32>
      %cst_22 = arith.constant 5.000000e-01 : f32
      %32 = vector.broadcast %cst_22 : f32 to vector<80x5xf32>
      %33 = arith.addf %31, %32 : vector<80x5xf32>
      %cst_23 = arith.constant 6.250000e-02 : f32
      %34 = vector.broadcast %cst_23 : f32 to vector<80x5xf32>
      %35 = arith.mulf %33, %34 : vector<80x5xf32>
      %36 = math.floor %35 : vector<80x5xf32>
      %37 = arith.fptosi %36 : vector<80x5xf32> to vector<80x5xi32>
      %c16_i32 = arith.constant 16 : i32
      %38 = vector.broadcast %c16_i32 : i32 to vector<80x5xi32>
      %39 = arith.muli %37, %38 : vector<80x5xi32>
      %40 = arith.subi %29, %39 : vector<80x5xi32>
      %c1_i32 = arith.constant 1 : i32
      %41 = vector.broadcast %c1_i32 : i32 to vector<80x5xi32>
      %42 = arith.cmpi sge, %40, %41 : vector<80x5xi32>
      %43 = vector.extract_strided_slice %42 {offsets = [0, 0], sizes = [80, 1], strides = [1, 1]} : vector<80x5xi1> to vector<80x1xi1>
      %cst_24 = arith.constant dense<0xFF800000> : vector<80xf32>
      %44 = vector.multi_reduction <maximumf>, %28, %cst_24 [1] : vector<80x5xf32> to vector<80xf32>
      %45 = vector.shape_cast %44 : vector<80xf32> to vector<80x1xf32>
      %46 = vector.broadcast %45 : vector<80x1xf32> to vector<80x5xf32>
      %47 = arith.subf %28, %46 : vector<80x5xf32>
      %48 = math.exp %47 : vector<80x5xf32>
      %cst_25 = arith.constant dense<0.000000e+00> : vector<80xf32>
      %49 = vector.multi_reduction <add>, %48, %cst_25 [1] : vector<80x5xf32> to vector<80xf32>
      %50 = vector.shape_cast %49 : vector<80xf32> to vector<80x1xf32>
      %51 = math.log %50 : vector<80x1xf32>
      %52 = arith.addf %45, %51 : vector<80x1xf32>
      %53 = arith.cmpi eq, %30, %37 : vector<80x5xi32>
      %cst_26 = arith.constant 0.000000e+00 : f32
      %54 = vector.broadcast %cst_26 : f32 to vector<80x5xf32>
      %55 = arith.select %53, %28, %54 : vector<80x5xi1>, vector<80x5xf32>
      %cst_27 = arith.constant dense<0.000000e+00> : vector<80xf32>
      %56 = vector.multi_reduction <add>, %55, %cst_27 [1] : vector<80x5xf32> to vector<80xf32>
      %57 = vector.shape_cast %56 : vector<80xf32> to vector<80x1xf32>
      %58 = arith.subf %52, %57 : vector<80x1xf32>
      %cst_28 = arith.constant 0.000000e+00 : f32
      %59 = vector.broadcast %cst_28 : f32 to vector<80x1xf32>
      %60 = arith.select %43, %58, %59 : vector<80x1xi1>, vector<80x1xf32>
      %61 = vector.shape_cast %60 : vector<80x1xf32> to vector<1x80x1xf32>
      %cst_29 = arith.constant dense<0.000000e+00> : vector<1xf32>
      %62 = vector.multi_reduction <add>, %61, %cst_29 [1, 2] : vector<1x80x1xf32> to vector<1xf32>
      %63 = vector.shape_cast %62 : vector<1xf32> to vector<1x1x1xf32>
      %64 = vector.extract %63[0, 0, 0] : f32 from vector<1x1x1xf32>
      %65 = vector.broadcast %45 : vector<80x1xf32> to vector<80x5xf32>
      %66 = arith.cmpf oge, %28, %65 : vector<80x5xf32>
      %c5_i32 = arith.constant 5 : i32
      %67 = vector.broadcast %c5_i32 : i32 to vector<80x5xi32>
      %68 = arith.select %66, %30, %67 : vector<80x5xi1>, vector<80x5xi32>
      %cst_30 = arith.constant dense<2147483647> : vector<80xi32>
      %69 = vector.multi_reduction <minsi>, %68, %cst_30 [1] : vector<80x5xi32> to vector<80xi32>
      %70 = vector.shape_cast %69 : vector<80xi32> to vector<80x1xi32>
      %71 = vector.extract_strided_slice %37 {offsets = [0, 0], sizes = [80, 1], strides = [1, 1]} : vector<80x5xi32> to vector<80x1xi32>
      %72 = arith.cmpi eq, %70, %71 : vector<80x1xi32>
      %73 = arith.andi %43, %72 : vector<80x1xi1>
      %cst_31 = arith.constant 1.000000e+00 : f32
      %cst_32 = arith.constant 0.000000e+00 : f32
      %74 = vector.broadcast %cst_31 : f32 to vector<80x1xf32>
      %75 = vector.broadcast %cst_32 : f32 to vector<80x1xf32>
      %76 = arith.select %73, %74, %75 : vector<80x1xi1>, vector<80x1xf32>
      %77 = vector.shape_cast %76 : vector<80x1xf32> to vector<1x80x1xf32>
      %cst_33 = arith.constant dense<0.000000e+00> : vector<1xf32>
      %78 = vector.multi_reduction <add>, %77, %cst_33 [1, 2] : vector<1x80x1xf32> to vector<1xf32>
      %79 = vector.shape_cast %78 : vector<1xf32> to vector<1x1x1xf32>
      %80 = vector.extract %79[0, 0, 0] : f32 from vector<1x1x1xf32>
      %cst_34 = arith.constant 0.0133333337 : f32
      %81 = arith.mulf %64, %cst_34 : f32
      %cst_35 = arith.constant 5.000000e-01 : f32
      %82 = arith.mulf %81, %cst_35 : f32
      %c0_36 = arith.constant 0 : index
      %83 = memref.load %arg2[%c0_36] : memref<3xf32, #tpu.memory_space<smem>>
      memref.store %82, %arg2[%c0_36] : memref<3xf32, #tpu.memory_space<smem>>
      %c1 = arith.constant 1 : index
      %84 = memref.load %arg2[%c1] : memref<3xf32, #tpu.memory_space<smem>>
      memref.store %81, %arg2[%c1] : memref<3xf32, #tpu.memory_space<smem>>
      %cst_37 = arith.constant 0.0133333337 : f32
      %85 = arith.mulf %80, %cst_37 : f32
      %c2 = arith.constant 2 : index
      %86 = memref.load %arg2[%c2] : memref<3xf32, #tpu.memory_space<smem>>
      memref.store %85, %arg2[%c2] : memref<3xf32, #tpu.memory_space<smem>>
    } else {
    }
    return
  }
  func.func @transform_0(%arg0: i32) -> (i32, i32) {
    %c0_i32 = arith.constant 0 : i32
    %c0_i32_0 = arith.constant 0 : i32
    return %c0_i32, %arg0 : i32, i32
  }
  func.func @transform_1(%arg0: i32) -> i32 {
    %c0_i32 = arith.constant 0 : i32
    %c0_i32_0 = arith.constant 0 : i32
    return %c0_i32 : i32
  }
}

</mosaic_0001>

<bundles_post_ra>
// kernel: tpu_custom_call.1
= control target key start
LH: loop header
LB: loop body
LE: loop exit
PB: predicated region body
PF: predicated region fallthrough
CT: control target
= control target key end

     0   :  { %6 = vsyncpa [#allocation5], 0  ;;  %s1602_s0 = inlined_call_operand.hbm [shape: f32[80,128], index: 0, kind: input, shape index: {}]   ;;  %s1603_s1 = inlined_call_operand.hbm [shape: f32[3], index: 1, kind: output, shape index: {}]  }
   0x1   :  { %7 = vsyncpa [#allocation6], 0  ;;  %s1020_s6 = smov [#allocation4]  }
   0x2   :  { %s13_s7 = sshll.u32 %s1020_s6, 4  ;;  %s14_s7 = int_to_ptr.vmem [resolvable:$true] %s13_s7 }
   0x3   :  { %s996_s8 = scalar_lea.vmem %s14_s7, 1280  ;;  %p1001_p1 = scmp.lt.s32.totalorder %s14_s7, %s14_s7 }
   0x4   :  { %p997_p0 = scmp.ne.s32.totalorder %s14_s7, %s996_s8  ;;  %p1002_p2 = scmp.lt.s32.totalorder %s996_s8, %s996_s8 }
   0x6   :  { %p1003_p3 = por %p1002_p2, %p1001_p1 }
   0x8   :  { %p1004_p4 = pnand %p1003_p3, %p997_p0 }
   0xa   :  { %1007 = shalt.err (!%p1004_p4)
}
   0xb   :  { %s1021_s9 = smov 128   ;;  %s1022_s10 = smov 8  }
   0xc   :  { %19 = dma.hbm_to_vmem [thread:$0]  %s1602_s0, 1280, %s14_s7, [#allocation5], %s1021_s9, %s1021_s9, %s1022_s10  }
   0xd   :  { %1016 = dma.done.wait [#allocation5], 1280  }
   0xe   :  { %1017 = vsyncadd [#allocation5], 4294966016  ;;  %vm27_vm0 = vcmask 39936   ;;  %v1604_v0 = vmov 0.0   ;;  %v51_v5 = vld [vmem:[#allocation4 + $0x30] sm:$0xff]  ;;  %v45_v6 = vld [vmem:[#allocation4] sm:$0xff]  ;;  %v278_v43 = vlaneseq }
   0xf   :  { %35 = vst.msk [vmem:[#allocation2 + $0x38] sm:$0xff] %vm27_vm0, %v1604_v0  ;;  %28 = vst.msk [vmem:[#allocation2] sm:$0xff] %vm27_vm0, %v1604_v0  ;;  %v40_v1 = vld [vmem:[#allocation4] ss:$16 sm:$0x3]  ;;  %905 = vmatprep.mubr.f32.mxu1 %v51_v5  ;;  %896 = vmatprep.mubr.f32.mxu0 %v45_v6  ;;  %v52_v8 = vld [vmem:[#allocation4 + $0x38] sm:$0xff] }
  0x10   :  { %29 = vst.msk [vmem:[#allocation2 + $0x8] sm:$0xff] %vm27_vm0, %v1604_v0  ;;  %30 = vst.msk [vmem:[#allocation2 + $0x10] sm:$0xff] %vm27_vm0, %v1604_v0  ;;  %v41_v2 = vld [vmem:[#allocation4] ss:$16 sm:$0xc]  ;;  %v46_v9 = vld [vmem:[#allocation4 + $0x8] sm:$0xff] }
  0x11   :  { %31 = vst.msk [vmem:[#allocation2 + $0x18] sm:$0xff] %vm27_vm0, %v1604_v0  ;;  %32 = vst.msk [vmem:[#allocation2 + $0x20] sm:$0xff] %vm27_vm0, %v1604_v0  ;;  %v42_v3 = vor.u32 %v41_v2, %v40_v1  ;;  %v43_v4 = vld [vmem:[#allocation4] ss:$16 sm:$0x10]  ;;  %v47_v11 = vld [vmem:[#allocation4 + $0x10] sm:$0xff] }
  0x12   :  { %33 = vst.msk [vmem:[#allocation2 + $0x28] sm:$0xff] %vm27_vm0, %v1604_v0  ;;  %34 = vst.msk [vmem:[#allocation2 + $0x30] sm:$0xff] %vm27_vm0, %v1604_v0  ;;  %v53_v10 = vld [vmem:[#allocation4 + $0x40] sm:$0xff]  ;;  %v54_v12 = vld [vmem:[#allocation4 + $0x48] sm:$0xff]  ;;  %vm1024_vm1 = vmmov 0   ;;  %vm38_vm2 = vcmask 36864  }
  0x13   :  { %36 = vst.msk [vmem:[#allocation2 + $0x40] sm:$0xff] %vm27_vm0, %v1604_v0  ;;  %37 = vst.msk [vmem:[#allocation2 + $0x48] sm:$0xff] %vm27_vm0, %v1604_v0  ;;  %v44_v7 = vor.u32 %v43_v4, %v42_v3  ;;  %v48_v13 = vld [vmem:[#allocation4 + $0x18] sm:$0xff]  ;;  %v49_v14 = vld [vmem:[#allocation4 + $0x20] sm:$0xff]  ;;  %v1073_v51 = vshrl.u32 %v278_v43, 7  ;;  %v1075_v52 = vand.u32 127, %v278_v43 }
  0x14   :  { %v50_v15 = vld [vmem:[#allocation4 + $0x28] sm:$0xff]  ;;  %39 = vst.msk [vmem:[#allocation3] sm:$0x1f] %vm38_vm2, %v1604_v0  ;;  %s1025_s17 = smov [#allocation7]  }
  0x15   :  { %916 = vmatprep.subr.mxu1 %v44_v7  ;;  %894 = vmatprep.subr.mxu0 %v44_v7  ;;  %vm282_vm3 = vcmp.eq.s32.totalorder %v1073_v51, %v1075_v52 }
  0x16   :  { %917 = vmatpush3.xpose.msra.mxu1 %v44_v7  ;;  %895 = vmatpush3.xpose.msra.mxu0 %v44_v7  ;;  %v177_v16 = vld [vmem:[#allocation2 + $0x38] sm:$0xff]  ;;  %v170_v21 = vld [vmem:[#allocation2] sm:$0xff] }
  0x17   :  { %911 = vmatprep.subr.mxu1 %v1604_v0  ;;  %v171_v17 = vld [vmem:[#allocation2 + $0x8] sm:$0xff]  ;;  %v172_v33 = vld [vmem:[#allocation2 + $0x10] sm:$0xff] }
  0x18   :  { %v173_v27 = vld [vmem:[#allocation2 + $0x18] sm:$0xff]  ;;  %v174_v45 = vld [vmem:[#allocation2 + $0x20] sm:$0xff] }
  0x19   :  { %906 = vmatmul.mubr.f32.vlgmr.msra.gmra.mxu1 %v52_v8  ;;  %897 = vmatmul.mubr.f32.vlgmr.msra.gmra.mxu0 %v46_v9  ;;  %v176_v19 = vld [vmem:[#allocation2 + $0x30] sm:$0xff]  ;;  %v175_v39 = vld [vmem:[#allocation2 + $0x28] sm:$0xff] }
  0x1a   :  { %912 = vmatpush3.xpose.msra.mxu1 %v44_v7  ;;  %908 = vmatprep.mubr.f32.mxu1 %v53_v10  ;;  %v179_v25 = vld [vmem:[#allocation2 + $0x48] sm:$0xff]  ;;  %v178_v31 = vld [vmem:[#allocation2 + $0x40] sm:$0xff] }
  0x1b   :  { %899 = vmatprep.mubr.f32.mxu0 %v47_v11  ;;  %v201_v37 = vld [vmem:[#allocation3] sm:$0x1f] }
  0x1d   :  { %909 = vmatmul.mubr.f32.gmra.mxu1 %v54_v12  ;;  %900 = vmatmul.mubr.f32.gmra.mxu0 %v48_v13 }
  0x1e   :  { %913 = vmatprep.mubr.msk.f32.mxu1 %vm1024_vm1, %v1604_v0  ;;  %902 = vmatprep.mubr.f32.mxu0 %v49_v14 }
  0x21   :  { %914 = vmatmul.mubr.f32.vlgmr.msra.gmra.mxu1 %v44_v7  ;;  %903 = vmatmul.mubr.f32.gmra.mxu0 %v50_v15 }
  0xd9   :  { %v907_v18 = vpop.f32.mrf.mxu1  ;;  %v898_v20 = vpop.f32.mrf.mxu0 }
  0xda   :  { %v187_v22 = vadd.f32 %v907_v18, %v177_v16  ;;  %v181_v23 = vadd.f32 %v898_v20, %v171_v17 }
  0xdb   :  { %v151_v24 = vpop.f32.mrf.mxu1  ;;  %v121_v26 = vpop.f32.mrf.mxu0 }
  0xdc   :  { %198 = vst.msk [vmem:[#allocation2 + $0x38] sm:$0xff] %vm27_vm0, %v187_v22  ;;  %v186_v28 = vadd.f32 %v176_v19, %v151_v24  ;;  %192 = vst.msk [vmem:[#allocation2 + $0x8] sm:$0xff] %vm27_vm0, %v181_v23  ;;  %v180_v29 = vadd.f32 %v170_v21, %v121_v26 }
  0xdd   :  { %v910_v30 = vpop.f32.mrf.mxu1  ;;  %v901_v32 = vpop.f32.mrf.mxu0 }
  0xde   :  { %197 = vst.msk [vmem:[#allocation2 + $0x30] sm:$0xff] %vm27_vm0, %v186_v28  ;;  %v189_v34 = vadd.f32 %v910_v30, %v179_v25  ;;  %191 = vst.msk [vmem:[#allocation2] sm:$0xff] %vm27_vm0, %v180_v29  ;;  %v183_v35 = vadd.f32 %v901_v32, %v173_v27 }
  0xdf   :  { %v161_v36 = vpop.f32.mrf.mxu1  ;;  %v131_v38 = vpop.f32.mrf.mxu0 }
  0xe0   :  { %200 = vst.msk [vmem:[#allocation2 + $0x48] sm:$0xff] %vm27_vm0, %v189_v34  ;;  %v188_v40 = vadd.f32 %v178_v31, %v161_v36  ;;  %194 = vst.msk [vmem:[#allocation2 + $0x18] sm:$0xff] %vm27_vm0, %v183_v35  ;;  %v182_v41 = vadd.f32 %v172_v33, %v131_v38 }
  0xe1   :  { %v268_v42 = vpop.f32.mrf.mxu1  ;;  %v904_v44 = vpop.f32.mrf.mxu0 }
  0xe2   :  { %199 = vst.msk [vmem:[#allocation2 + $0x40] sm:$0xff] %vm27_vm0, %v188_v40  ;;  %v272_v46 = vadd.f32 %v268_v42, %v201_v37  ;;  %193 = vst.msk [vmem:[#allocation2 + $0x10] sm:$0xff] %vm27_vm0, %v182_v41  ;;  %v185_v47 = vadd.f32 %v904_v44, %v175_v39  ;;  %v1122_v39 = vadd.s32 8, %v1073_v51  ;;  %v1125_v40 = vadd.s32 16, %v1073_v51 }
  0xe3   :  { %v915_v48 = vpop.f32.mrf.mxu1  ;;  %v141_v49 = vpop.f32.mrf.mxu0  ;;  %v293_v2 = vld [vmem:[#allocation2 + $0x8] sm:$0xff]  ;;  %v299_v17 = vld [vmem:[#allocation2 + $0x38] sm:$0xff]  ;;  %v1128_v41 = vadd.s32 24, %v1073_v51  ;;  %v331_v42 = vcvt.s32.f32 %v1073_v51 }
  0xe4   :  { %274 = vst.msk [vmem:[#allocation3] sm:$0x1f] %vm38_vm2, %v272_v46  ;;  %v184_v50 = vadd.f32 %v174_v45, %v141_v49  ;;  %v303_v10 = vmul.f32 2.0, %v293_v2  ;;  %v309_v23 = vmul.f32 2.0, %v299_v17  ;;  %v332_v43 = vcvt.s32.f32 %v1122_v39 }
  0xe5   :  { %196 = vst.msk [vmem:[#allocation2 + $0x28] sm:$0xff] %vm27_vm0, %v185_v47  ;;  %v292_v61 = vld [vmem:[#allocation2] sm:$0xff]  ;;  %v298_v18 = vld [vmem:[#allocation2 + $0x30] sm:$0xff]  ;;  %v333_v46 = vcvt.s32.f32 %v1125_v40  ;;  %v334_v47 = vcvt.s32.f32 %v1128_v41 }
  0xe6   :  { %195 = vst.msk [vmem:[#allocation2 + $0x20] sm:$0xff] %vm27_vm0, %v184_v50  ;;  %v302_v4 = vmul.f32 2.0, %v292_v61  ;;  %v308_v24 = vmul.f32 2.0, %v298_v18  ;;  %v341_v50 = vadd.f32 0.5, %v331_v42 }
  0xe7   :  { %v295_v62 = vld [vmem:[#allocation2 + $0x18] sm:$0xff]  ;;  %v301_v25 = vld [vmem:[#allocation2 + $0x48] sm:$0xff]  ;;  %v344_v61 = vadd.f32 0.5, %v334_v47 }
  0xe8   :  { %v305_v5 = vmul.f32 2.0, %v295_v62  ;;  %v311_v31 = vmul.f32 2.0, %v301_v25 }
  0xe9   :  { %v294_v59 = vld [vmem:[#allocation2 + $0x10] sm:$0xff]  ;;  %v300_v26 = vld [vmem:[#allocation2 + $0x40] sm:$0xff] }
  0xea   :  { %v304_v1 = vmul.f32 2.0, %v294_v59  ;;  %v310_v32 = vmul.f32 2.0, %v300_v26  ;;  %v343_v59 = vadd.f32 0.5, %v333_v46 }
  0xeb   :  { %v283_v53 = vld [vmem:[#allocation3] sm:$0x1f] }
  0xec   :  { %v284_v54 = vsel %vm282_vm3, %v283_v53, 0.0  ;;  %v297_v6 = vld [vmem:[#allocation2 + $0x28] sm:$0xff] }
  0xed   :  { %v285_v55 = vsel %vm38_vm2, %v284_v54, 0.0  ;;  %v296_v7 = vld [vmem:[#allocation2 + $0x20] sm:$0xff]  ;;  %v307_v11 = vmul.f32 2.0, %v297_v6  ;;  %v342_v54 = vadd.f32 0.5, %v332_v43 }
  0xee   :  { %v286_v56 = vrot.slane %v285_v55, 4  ;;  %v306_v12 = vmul.f32 2.0, %v296_v7 }
  0xf0   :  { %v287_v57 = vadd.f32 %v286_v56, %v285_v55 }
  0xf2   :  { %v288_v58 = vrot.slane %v287_v57, 2 }
  0xf4   :  { %v289_v60 = vadd.f32 %v288_v58, %v287_v57 }
  0xf6   :  { %v290_v63 = vrot.slane %v289_v60, 1 }
  0xf8   :  { %v291_v3 = vadd.f32 %v290_v63, %v289_v60  ;;  %v1156_v60 = vadd.s32 32, %v1073_v51 }
  0xfa   :  { %v1081_v8 = vsub.f32 %v304_v1, %v291_v3  ;;  %v1083_v9 = vsub.f32 %v302_v4, %v291_v3  ;;  %v1089_v15 = vsub.f32 %v305_v5, %v291_v3  ;;  %v1091_v16 = vsub.f32 %v303_v10, %v291_v3 }
  0xfb   :  { %v1097_v21 = vsub.f32 %v307_v11, %v291_v3  ;;  %v1099_v22 = vsub.f32 %v306_v12, %v291_v3  ;;  %v1105_v29 = vsub.f32 %v309_v23, %v291_v3  ;;  %v1107_v30 = vsub.f32 %v308_v24, %v291_v3 }
  0xfc   :  { %v417_v13 = vsel %vm27_vm0, %v1081_v8, -inf  ;;  %v411_v14 = vsel %vm27_vm0, %v1083_v9, -inf  ;;  %v420_v19 = vsel %vm27_vm0, %v1089_v15, -inf  ;;  %v414_v20 = vsel %vm27_vm0, %v1091_v16, -inf }
  0xfd   :  { %418 = vmax.xlane.f32.xlu1 %v417_v13  ;;  %412 = vmax.xlane.f32.xlu0 %v411_v14  ;;  %v426_v27 = vsel %vm27_vm0, %v1097_v21, -inf  ;;  %v423_v28 = vsel %vm27_vm0, %v1099_v22, -inf  ;;  %v432_v33 = vsel %vm27_vm0, %v1105_v29, -inf  ;;  %v429_v34 = vsel %vm27_vm0, %v1107_v30, -inf }
  0xfe   :  { %v1113_v35 = vsub.f32 %v311_v31, %v291_v3  ;;  %v1115_v36 = vsub.f32 %v310_v32, %v291_v3  ;;  %v351_v1 = vmul.f32 0.0625, %v341_v50  ;;  %v352_v4 = vmul.f32 0.0625, %v342_v54 }
  0xff   :  { %v353_v10 = vmul.f32 0.0625, %v343_v59  ;;  %v335_v11 = vcvt.s32.f32 %v1156_v60  ;;  %v354_v14 = vmul.f32 0.0625, %v344_v61 }
 0x100   :  { %v438_v37 = vsel %vm27_vm0, %v1113_v35, -inf  ;;  %v435_v38 = vsel %vm27_vm0, %v1115_v36, -inf  ;;  %v362_v25 = vfloor.f32 %v352_v4 }
 0x101   :  { %421 = vmax.xlane.f32.xlu1 %v420_v19  ;;  %415 = vmax.xlane.f32.xlu0 %v414_v20  ;;  %v361_v19 = vfloor.f32 %v351_v1  ;;  %v364_v46 = vfloor.f32 %v354_v14 }
 0x102   :  { %v920_v50 = vtrunc.f32 %v362_v25 }
 0x103   :  { %v918_v43 = vtrunc.f32 %v361_v19 }
 0x105   :  { %427 = vmax.xlane.f32.xlu1 %v426_v27  ;;  %424 = vmax.xlane.f32.xlu0 %v423_v28 }
 0x109   :  { %433 = vmax.xlane.f32.xlu1 %v432_v33  ;;  %430 = vmax.xlane.f32.xlu0 %v429_v34  ;;  %v345_v33 = vadd.f32 0.5, %v335_v11 }
 0x10d   :  { %439 = vmax.xlane.f32.xlu1 %v438_v37  ;;  %436 = vmax.xlane.f32.xlu0 %v435_v38  ;;  %v363_v38 = vfloor.f32 %v353_v10  ;;  %v1238_v10 = vcvt.f32.s32 %v918_v43  ;;  %v924_v43 = vtrunc.f32 %v364_v46 }
 0x10f   :  { %v922_v11 = vtrunc.f32 %v363_v38  ;;  %vm531_vm14 = vcmp.eq.s32.totalorder %v1075_v52, %v1238_v10  ;;  %v1278_v46 = vcvt.f32.s32 %v924_v43 }
 0x111   :  { %vm534_vm2 = vcmp.eq.s32.totalorder %v1075_v52, %v1278_v46 }
 0x186   :  { %v1132_v44 = vpop.xlane.xlu1 %418  ;;  %v1134_v45 = vpop.xlane.xlu0 %412 }
 0x187   :  { %vm632_vm4 = vcmp.ge.f32.partialorder %v1081_v8, %v1132_v44  ;;  %vm630_vm5 = vcmp.ge.f32.partialorder %v1083_v9, %v1134_v45  ;;  %v441_v12 = vsub.f32 %v1083_v9, %v1134_v45  ;;  %v443_v20 = vsub.f32 %v1081_v8, %v1132_v44 }
 0x188   :  { %v640_v48 = vsel %vm630_vm5, %v1075_v52, 5  ;;  %v642_v49 = vsel %vm632_vm4, %v1075_v52, 5 }
 0x189   :  { %v1145_v53 = vsel %vm27_vm0, %v640_v48, 2147483647  ;;  %v1153_v58 = vsel %vm27_vm0, %v642_v49, 2147483647  ;;  %v451_v34 = vmul.f32 1.442695, %v441_v12 }
 0x18a   :  { %v1147_v55 = vpop.xlane.xlu1 %421  ;;  %v1149_v56 = vpop.xlane.xlu0 %415  ;;  %v652_v57 = vshra.s32 %v1145_v53, 16  ;;  %v682_v63 = vshra.s32 %v1153_v58, 16  ;;  %v455_v47 = vmul.f32 1.442695, %v443_v20 }
 0x18b   :  { %vm633_vm6 = vcmp.ge.f32.partialorder %v1089_v15, %v1147_v55  ;;  %vm631_vm7 = vcmp.ge.f32.partialorder %v1091_v16, %v1149_v56  ;;  %948 = vpow2.f32 %v451_v34 }
 0x18c   :  { %v1162_v62 = vcvt.s32.f32 %v652_v57  ;;  %v641_v2 = vsel %vm631_vm7, %v1075_v52, 5  ;;  %v643_v3 = vsel %vm633_vm6, %v1075_v52, 5  ;;  %v1185_v17 = vcvt.s32.f32 %v682_v63 }
 0x18d   :  { %v1173_v7 = vsel %vm27_vm0, %v641_v2, 2147483647  ;;  %v1181_v13 = vsel %vm27_vm0, %v643_v3, 2147483647  ;;  %950 = vpow2.f32 %v455_v47  ;;  %v355_v47 = vmul.f32 0.0625, %v345_v33 }
 0x18e   :  { %v1167_v5 = vpop.xlane.xlu1 %427  ;;  %655 = vmin.xlane.f32.xlu0 %v1162_v62  ;;  %v1170_v6 = vpop.xlane.xlu0 %424  ;;  %v667_v18 = vshra.s32 %v1173_v7, 16  ;;  %v697_v31 = vshra.s32 %v1181_v13, 16  ;;  %v541_v33 = vsel %vm531_vm14, %v1083_v9, 0.0 }
 0x18f   :  { %vm635_vm8 = vcmp.ge.f32.partialorder %v1097_v21, %v1167_v5  ;;  %vm634_vm9 = vcmp.ge.f32.partialorder %v1099_v22, %v1170_v6  ;;  %v445_v2 = vsub.f32 %v1099_v22, %v1170_v6 }
 0x190   :  { %v644_v23 = vsel %vm634_vm9, %v1075_v52, 5  ;;  %v645_v24 = vsel %vm635_vm8, %v1075_v52, 5  ;;  %v1195_v27 = vcvt.s32.f32 %v667_v18  ;;  %v1216_v57 = vcvt.s32.f32 %v697_v31 }
 0x191   :  { %v1201_v32 = vsel %vm27_vm0, %v644_v23, 2147483647  ;;  %v1206_v37 = vsel %vm27_vm0, %v645_v24, 2147483647  ;;  %v1242_v18 = vcvt.f32.s32 %v920_v50  ;;  %v459_v25 = vmul.f32 1.442695, %v445_v2 }
 0x192   :  { %v1192_v26 = vpop.xlane.xlu1 %433  ;;  %685 = vmin.xlane.f32.xlu0 %v1185_v17  ;;  %v1197_v28 = vpop.xlane.xlu0 %430  ;;  %670 = vmin.xlane.f32.xlu1 %v1195_v27  ;;  %v712_v42 = vshra.s32 %v1201_v32, 16  ;;  %v727_v63 = vshra.s32 %v1206_v37, 16 }
 0x193   :  { %1612 = vst [vmem:[#allocation10_spill] sm:$0xff] %v1192_v26  ;;  %1613 = vst [vmem:[#allocation11_spill] sm:$0xff] %v1197_v28  ;;  %vm637_vm10 = vcmp.ge.f32.partialorder %v1105_v29, %v1192_v26  ;;  %vm636_vm11 = vcmp.ge.f32.partialorder %v1107_v30, %v1197_v28  ;;  %v447_v31 = vsub.f32 %v1107_v30, %v1197_v28  ;;  %952 = vpow2.f32 %v459_v25 }
 0x194   :  { %v646_v48 = vsel %vm636_vm11, %v1075_v52, 5  ;;  %v647_v49 = vsel %vm637_vm10, %v1075_v52, 5  ;;  %v1218_v59 = vcvt.s32.f32 %v712_v42  ;;  %v1244_v19 = vcvt.s32.f32 %v727_v63 }
 0x195   :  { %v1224_v1 = vsel %vm27_vm0, %v646_v48, 2147483647  ;;  %v1231_v3 = vsel %vm27_vm0, %v647_v49, 2147483647  ;;  %v442_v48 = vsub.f32 %v1091_v16, %v1149_v56  ;;  %v1269_v63 = vcvt.f32.s32 %v922_v11 }
 0x196   :  { %v1214_v54 = vpop.xlane.xlu1 %439  ;;  %v1220_v61 = vpop.xlane.xlu0 %436  ;;  %700 = vmin.xlane.f32.xlu1 %v1216_v57  ;;  %715 = vmin.xlane.f32.xlu0 %v1218_v59  ;;  %v742_v4 = vshra.s32 %v1224_v1, 16  ;;  %v757_v23 = vshra.s32 %v1231_v3, 16  ;;  %v463_v2 = vmul.f32 1.442695, %v447_v31  ;;  %vm532_vm15 = vcmp.eq.s32.totalorder %v1075_v52, %v1242_v18 }
 0x197   :  { %1614 = vst [vmem:[#allocation12_spill] sm:$0xff] %v1214_v54  ;;  %1615 = vst [vmem:[#allocation13_spill] sm:$0xff] %v1220_v61  ;;  %vm639_vm12 = vcmp.ge.f32.partialorder %v1113_v35, %v1214_v54  ;;  %vm638_vm13 = vcmp.ge.f32.partialorder %v1115_v36, %v1220_v61  ;;  %vm533_vm1 = vcmp.eq.s32.totalorder %v1075_v52, %v1269_v63 }
 0x198   :  { %v648_v12 = vsel %vm638_vm13, %v1075_v52, 5  ;;  %v649_v14 = vsel %vm639_vm12, %v1075_v52, 5  ;;  %v1246_v20 = vcvt.s32.f32 %v742_v4  ;;  %v1266_v49 = vcvt.s32.f32 %v757_v23  ;;  %v949_v0 = vpop.eup %948 }
 0x199   :  { %v1250_v24 = vsel %vm27_vm0, %v648_v12, 2147483647  ;;  %v1256_v38 = vsel %vm27_vm0, %v649_v14, 2147483647  ;;  %v449_v4 = vsub.f32 %v1115_v36, %v1220_v61  ;;  %v365_v12 = vfloor.f32 %v355_v47 }
 0x19a   :  { %v772_v34 = vshra.s32 %v1250_v24, 16  ;;  %730 = vmin.xlane.f32.xlu1 %v1244_v19  ;;  %745 = vmin.xlane.f32.xlu0 %v1246_v20  ;;  %v787_v50 = vshra.s32 %v1256_v38, 16  ;;  %v453_v14 = vmul.f32 1.442695, %v442_v48  ;;  %v542_v23 = vsel %vm532_vm15, %v1091_v16, 0.0  ;;  %v951_v43 = vpop.eup %950 }
 0x19b   :  { %v444_v25 = vsub.f32 %v1089_v15, %v1147_v55  ;;  %954 = vpow2.f32 %v463_v2  ;;  %v467_v31 = vmul.f32 1.442695, %v449_v4  ;;  %v926_v9 = vtrunc.f32 %v365_v12 }
 0x19c   :  { %v1260_v42 = vcvt.s32.f32 %v772_v34  ;;  %v1280_v11 = vcvt.s32.f32 %v787_v50  ;;  %v551_v34 = vsel %vm27_vm0, %v541_v33, 0.0  ;;  %956 = vpow2.f32 %v453_v14 }
 0x19d   :  { %v554_v47 = vsel %vm27_vm0, %v542_v23, 0.0  ;;  %v543_v16 = vsel %vm533_vm1, %v1081_v8, 0.0  ;;  %v457_v48 = vmul.f32 1.442695, %v444_v25  ;;  %v446_v50 = vsub.f32 %v1097_v21, %v1167_v5 }
 0x19e   :  { %760 = vmin.xlane.f32.xlu1 %v1266_v49  ;;  %775 = vmin.xlane.f32.xlu0 %v1260_v42  ;;  %958 = vpow2.f32 %v467_v31  ;;  %v471_v2 = vsel %vm27_vm0, %v949_v0, 0.0  ;;  %v1296_v4 = vcvt.f32.s32 %v926_v9  ;;  %v557_v33 = vsel %vm27_vm0, %v543_v16, 0.0 }
 0x19f   :  { %v544_v12 = vsel %vm534_vm2, %v1089_v15, 0.0  ;;  %960 = vpow2.f32 %v457_v48  ;;  %v461_v8 = vmul.f32 1.442695, %v446_v50  ;;  %v448_v14 = vsub.f32 %v1105_v29, %v1192_v26 }
 0x1a0   :  { %v477_v23 = vsel %vm27_vm0, %v951_v43, 0.0  ;;  %v953_v25 = vpop.eup %952  ;;  %vm535_vm3 = vcmp.eq.s32.totalorder %v1075_v52, %v1296_v4  ;;  %v560_v0 = vsel %vm27_vm0, %v544_v12, 0.0  ;;  %v450_v15 = vsub.f32 %v1113_v35, %v1214_v54 }
 0x1a1   :  { %962 = vpow2.f32 %v461_v8  ;;  %v465_v31 = vmul.f32 1.442695, %v448_v14  ;;  %v545_v43 = vsel %vm535_vm3, %v1099_v22, 0.0 }
 0x1a2   :  { %790 = vmin.xlane.f32.xlu1 %v1280_v11  ;;  %552 = vadd.xlane.f32.xlu0 %v551_v34  ;;  %v483_v34 = vsel %vm27_vm0, %v953_v25, 0.0  ;;  %v469_v16 = vmul.f32 1.442695, %v450_v15  ;;  %v563_v48 = vsel %vm27_vm0, %v545_v43, 0.0 }
 0x1a3   :  { %964 = vpow2.f32 %v465_v31 }
 0x1a4   :  { %966 = vpow2.f32 %v469_v16  ;;  %v1327_v16 = vadd.s32 56, %v1073_v51 }
 0x1a6   :  { %555 = vadd.xlane.f32.xlu1 %v554_v47  ;;  %472 = vadd.xlane.f32.xlu0 %v471_v2 }
 0x1a8   :  { %v955_v9 = vpop.eup %954 }
 0x1a9   :  { %v957_v47 = vpop.eup %956  ;;  %v489_v50 = vsel %vm27_vm0, %v955_v9, 0.0  ;;  %v1322_v9 = vadd.s32 48, %v1073_v51 }
 0x1aa   :  { %558 = vadd.xlane.f32.xlu1 %v557_v33  ;;  %478 = vadd.xlane.f32.xlu0 %v477_v23  ;;  %v474_v33 = vsel %vm27_vm0, %v957_v47, 0.0 }
 0x1ab   :  { %v959_v2 = vpop.eup %958  ;;  %v337_v47 = vcvt.s32.f32 %v1322_v9 }
 0x1ac   :  { %v495_v12 = vsel %vm27_vm0, %v959_v2, 0.0  ;;  %v961_v8 = vpop.eup %960  ;;  %v338_v2 = vcvt.s32.f32 %v1327_v16 }
 0x1ad   :  { %v480_v22 = vsel %vm27_vm0, %v961_v8, 0.0  ;;  %v1334_v8 = vadd.s32 72, %v1073_v51 }
 0x1ae   :  { %561 = vadd.xlane.f32.xlu1 %v560_v0  ;;  %484 = vadd.xlane.f32.xlu0 %v483_v34  ;;  %v963_v14 = vpop.eup %962  ;;  %v1319_v34 = vadd.s32 40, %v1073_v51 }
 0x1af   :  { %v486_v23 = vsel %vm27_vm0, %v963_v14, 0.0  ;;  %1617 = vst [vmem:[#allocation15_spill] sm:$0xff] %v1334_v8  ;;  %v348_v14 = vadd.f32 0.5, %v338_v2 }
 0x1b0   :  { %v965_v25 = vpop.eup %964  ;;  %v336_v43 = vcvt.s32.f32 %v1319_v34 }
 0x1b1   :  { %v492_v0 = vsel %vm27_vm0, %v965_v25, 0.0  ;;  %v967_v31 = vpop.eup %966 }
 0x1b2   :  { %564 = vadd.xlane.f32.xlu1 %v563_v48  ;;  %490 = vadd.xlane.f32.xlu0 %v489_v50  ;;  %v498_v15 = vsel %vm27_vm0, %v967_v31, 0.0  ;;  %v346_v48 = vadd.f32 0.5, %v336_v43  ;;  %v347_v50 = vadd.f32 0.5, %v337_v47  ;;  %v340_v31 = vcvt.s32.f32 %v1334_v8 }
 0x1b3   :  { %v358_v43 = vmul.f32 0.0625, %v348_v14 }
 0x1b4   :  { %v350_v28 = vadd.f32 0.5, %v340_v31 }
 0x1b5   :  { %v368_v2 = vfloor.f32 %v358_v43 }
 0x1b6   :  { %475 = vadd.xlane.f32.xlu1 %v474_v33  ;;  %496 = vadd.xlane.f32.xlu0 %v495_v12  ;;  %v1331_v33 = vadd.s32 64, %v1073_v51  ;;  %v356_v12 = vmul.f32 0.0625, %v346_v48  ;;  %v681_v48 = vand.u32 65535, %v1153_v58 }
 0x1b8   :  { %1616 = vst [vmem:[#allocation14_spill] sm:$0xff] %v1331_v33  ;;  %v366_v25 = vfloor.f32 %v356_v12  ;;  %v683_v14 = vcvt.s32.f32 %v681_v48 }
 0x1ba   :  { %481 = vadd.xlane.f32.xlu1 %v480_v22  ;;  %v357_v22 = vmul.f32 0.0625, %v347_v50  ;;  %v928_v54 = vtrunc.f32 %v366_v25  ;;  %v932_v25 = vtrunc.f32 %v368_v2 }
 0x1bc   :  { %v1345_v8 = vcvt.f32.s32 %v928_v54  ;;  %v1368_v48 = vcvt.f32.s32 %v932_v25 }
 0x1be   :  { %487 = vadd.xlane.f32.xlu1 %v486_v23  ;;  %v339_v23 = vcvt.s32.f32 %v1331_v33  ;;  %vm536_vm6 = vcmp.eq.s32.totalorder %v1075_v52, %v1345_v8  ;;  %vm538_vm11 = vcmp.eq.s32.totalorder %v1075_v52, %v1368_v48 }
 0x1c0   :  { %v349_v47 = vadd.f32 0.5, %v339_v23  ;;  %v360_v23 = vmul.f32 0.0625, %v350_v28 }
 0x1c2   :  { %493 = vadd.xlane.f32.xlu1 %v492_v0  ;;  %v651_v0 = vand.u32 65535, %v1145_v53  ;;  %v359_v12 = vmul.f32 0.0625, %v349_v47  ;;  %v666_v53 = vand.u32 65535, %v1173_v7  ;;  %v696_v7 = vand.u32 65535, %v1181_v13 }
 0x1c3   :  { %v711_v13 = vand.u32 65535, %v1201_v32  ;;  %v726_v32 = vand.u32 65535, %v1206_v37  ;;  %v741_v37 = vand.u32 65535, %v1224_v1  ;;  %v756_v1 = vand.u32 65535, %v1231_v3 }
 0x1c4   :  { %v653_v26 = vcvt.s32.f32 %v651_v0  ;;  %v668_v31 = vcvt.s32.f32 %v666_v53  ;;  %v698_v47 = vcvt.s32.f32 %v696_v7 }
 0x1c5   :  { %v713_v53 = vcvt.s32.f32 %v711_v13  ;;  %v728_v25 = vcvt.s32.f32 %v726_v32  ;;  %v743_v7 = vcvt.s32.f32 %v741_v37 }
 0x1c6   :  { %499 = vadd.xlane.f32.xlu1 %v498_v15  ;;  %v367_v15 = vfloor.f32 %v357_v22 }
 0x1c8   :  { %v930_v50 = vtrunc.f32 %v367_v15 }
 0x1ca   :  { %v1351_v58 = vcvt.f32.s32 %v930_v50 }
 0x1cc   :  { %vm537_vm8 = vcmp.eq.s32.totalorder %v1075_v52, %v1351_v58 }
 0x1cd   :  { %v547_v50 = vsel %vm537_vm8, %v1107_v30, 0.0  ;;  %v548_v30 = vsel %vm538_vm11, %v1105_v29, 0.0 }
 0x217   :  { %v1339_v61 = vpop.xlane.xlu0 %655 }
 0x218   :  { %vm657_vm4 = vcmp.eq.f32.partialorder %v1162_v62, %v1339_v61  ;;  %v369_v62 = vfloor.f32 %v359_v12 }
 0x219   :  { %v658_v33 = vsel %vm657_vm4, %v653_v26, inf }
 0x21a   :  { %659 = vmin.xlane.f32.xlu0 %v658_v33  ;;  %v934_v54 = vtrunc.f32 %v369_v62  ;;  %v370_v33 = vfloor.f32 %v360_v23 }
 0x21b   :  { %v1347_v22 = vpop.xlane.xlu0 %685  ;;  %v1353_v0 = vpop.xlane.xlu1 %670 }
 0x21c   :  { %vm687_vm5 = vcmp.eq.f32.partialorder %v1185_v17, %v1347_v22  ;;  %vm672_vm7 = vcmp.eq.f32.partialorder %v1195_v27, %v1353_v0  ;;  %v546_v17 = vsel %vm536_vm6, %v1097_v21, 0.0  ;;  %v936_v2 = vtrunc.f32 %v370_v33 }
 0x21d   :  { %v688_v26 = vsel %vm687_vm5, %v683_v14, inf  ;;  %v673_v28 = vsel %vm672_vm7, %v668_v31, inf  ;;  %v566_v27 = vsel %vm27_vm0, %v546_v17, 0.0  ;;  %v569_v14 = vsel %vm27_vm0, %v547_v50, 0.0 }
 0x21e   :  { %689 = vmin.xlane.f32.xlu0 %v688_v26  ;;  %674 = vmin.xlane.f32.xlu1 %v673_v28  ;;  %v1392_v62 = vcvt.f32.s32 %v936_v2  ;;  %v572_v31 = vsel %vm27_vm0, %v548_v30, 0.0  ;;  %v771_v33 = vand.u32 65535, %v1250_v24 }
 0x21f   :  { %v1361_v15 = vpop.xlane.xlu1 %700  ;;  %v1363_v43 = vpop.xlane.xlu0 %715 }
 0x220   :  { %vm702_vm9 = vcmp.eq.f32.partialorder %v1216_v57, %v1361_v15  ;;  %vm717_vm10 = vcmp.eq.f32.partialorder %v1218_v59, %v1363_v43  ;;  %v1381_v57 = vcvt.f32.s32 %v934_v54  ;;  %vm540_vm15 = vcmp.eq.s32.totalorder %v1075_v52, %v1392_v62 }
 0x221   :  { %v703_v21 = vsel %vm702_vm9, %v698_v47, inf  ;;  %v718_v23 = vsel %vm717_vm10, %v713_v53, inf  ;;  %v550_v54 = vsel %vm540_vm15, %v1113_v35, 0.0  ;;  %v773_v13 = vcvt.s32.f32 %v771_v33 }
 0x222   :  { %567 = vadd.xlane.f32.xlu1 %v566_v27  ;;  %704 = vmin.xlane.f32.xlu0 %v703_v21  ;;  %vm539_vm13 = vcmp.eq.s32.totalorder %v1075_v52, %v1381_v57  ;;  %v578_v47 = vsel %vm27_vm0, %v550_v54, 0.0  ;;  %v786_v35 = vand.u32 65535, %v1256_v38 }
 0x223   :  { %v1376_v12 = vpop.xlane.xlu1 %730  ;;  %v1387_v59 = vpop.xlane.xlu0 %745  ;;  %v549_v29 = vsel %vm539_vm13, %v1115_v36, 0.0 }
 0x224   :  { %vm732_vm12 = vcmp.eq.f32.partialorder %v1244_v19, %v1376_v12  ;;  %vm747_vm14 = vcmp.eq.f32.partialorder %v1246_v20, %v1387_v59  ;;  %v575_v28 = vsel %vm27_vm0, %v549_v29, 0.0  ;;  %v758_v20 = vcvt.s32.f32 %v756_v1 }
 0x225   :  { %v733_v26 = vsel %vm732_vm12, %v728_v25, inf  ;;  %v748_v17 = vsel %vm747_vm14, %v743_v7, inf  ;;  %v381_v29 = vmul.u32 16, %v1238_v10  ;;  %v382_v1 = vmul.u32 16, %v1242_v18 }
 0x226   :  { %570 = vadd.xlane.f32.xlu1 %v569_v14  ;;  %719 = vmin.xlane.f32.xlu0 %v718_v23  ;;  %vm601_vm0 = vcmask 7168  }
 0x227   :  { %v1398_v19 = vpop.xlane.xlu1 %760  ;;  %v1407_v36 = vpop.xlane.xlu0 %775 }
 0x228   :  { %vm762_vm1 = vcmp.eq.f32.partialorder %v1266_v49, %v1398_v19  ;;  %vm777_vm2 = vcmp.eq.f32.partialorder %v1260_v42, %v1407_v36  ;;  %v788_v49 = vcvt.s32.f32 %v786_v35 }
 0x229   :  { %v763_v52 = vsel %vm762_vm1, %v758_v20, inf  ;;  %v778_v27 = vsel %vm777_vm2, %v773_v13, inf  ;;  %v385_v20 = vmul.u32 16, %v1296_v4 }
 0x22a   :  { %573 = vadd.xlane.f32.xlu1 %v572_v31  ;;  %734 = vmin.xlane.f32.xlu0 %v733_v26  ;;  %v384_v31 = vmul.u32 16, %v1278_v46 }
 0x22b   :  { %v1413_v3 = vpop.xlane.xlu1 %790  ;;  %v1424_v42 = vpop.xlane.xlu0 %552 }
 0x22c   :  { %vm792_vm3 = vcmp.eq.f32.partialorder %v1280_v11, %v1413_v3  ;;  %v1438_v35 = vsub.s32 %v1128_v41, %v384_v31  ;;  %v677_v41 = vcvt.f32.s32 %v1353_v0 }
 0x22d   :  { %v793_v24 = vsel %vm792_vm3, %v788_v49, inf }
 0x22e   :  { %576 = vadd.xlane.f32.xlu1 %v575_v28  ;;  %749 = vmin.xlane.f32.xlu0 %v748_v17  ;;  %v383_v28 = vmul.u32 16, %v1269_v63  ;;  %vm404_vm5 = vcmp.ge.s32.totalorder %v1438_v35, 1  ;;  %v390_v35 = vmul.u32 16, %v1392_v62 }
 0x22f   :  { %v1418_v21 = vpop.xlane.xlu1 %555  ;;  %v473_v32 = vpop.xlane.xlu0 %472 }
 0x230   :  { %v1444_v49 = vsub.s32 %v1125_v40, %v383_v28  ;;  %v707_v40 = vcvt.f32.s32 %v1361_v15  ;;  %v752_v15 = vcvt.f32.s32 %v1387_v59 }
 0x232   :  { %579 = vadd.xlane.f32.xlu1 %v578_v47  ;;  %764 = vmin.xlane.f32.xlu0 %v763_v52  ;;  %v1434_v47 = vsub.s32 %v1073_v51, %v381_v29  ;;  %v1449_v51 = vsub.s32 %v1156_v60, %v385_v20  ;;  %vm403_vm7 = vcmp.ge.s32.totalorder %v1444_v49, 1 }
 0x233   :  { %v1420_v50 = vpop.xlane.xlu1 %558  ;;  %v479_v14 = vpop.xlane.xlu0 %478 }
 0x234   :  { %vm401_vm4 = vcmp.ge.s32.totalorder %v1434_v47, 1  ;;  %vm405_vm8 = vcmp.ge.s32.totalorder %v1449_v51, 1 }
 0x236   :  { %779 = vmin.xlane.f32.xlu0 %v778_v27  ;;  %v1441_v27 = vsub.s32 %v1122_v39, %v382_v1 }
 0x237   :  { %v1422_v2 = vpop.xlane.xlu1 %561  ;;  %v485_v11 = vpop.xlane.xlu0 %484 }
 0x238   :  { %vm402_vm6 = vcmp.ge.s32.totalorder %v1441_v27, 1 }
 0x23a   :  { %794 = vmin.xlane.f32.xlu0 %v793_v24  ;;  %v662_v24 = vcvt.f32.s32 %v1339_v61 }
 0x23b   :  { %v1426_v53 = vpop.xlane.xlu1 %564  ;;  %v491_v26 = vpop.xlane.xlu0 %490 }
 0x23c   :  { %v663_v60 = vshll.u32 %v662_v24, 16 }
 0x23f   :  { %v476_v38 = vpop.xlane.xlu1 %475 }
 0x240   :  { %968 = vlog2.f32 %v476_v38 }
 0x241   :  { %970 = vlog2.f32 %v473_v32 }
 0x242   :  { %972 = vlog2.f32 %v479_v14  ;;  %v497_v14 = vpop.xlane.xlu0 %496 }
 0x243   :  { %v482_v23 = vpop.xlane.xlu1 %481 }
 0x244   :  { %974 = vlog2.f32 %v482_v23  ;;  %v722_v23 = vcvt.f32.s32 %v1363_v43 }
 0x245   :  { %976 = vlog2.f32 %v485_v11  ;;  %v737_v11 = vcvt.f32.s32 %v1376_v12 }
 0x246   :  { %v1469_v12 = vshll.u32 %v722_v23, 16 }
 0x247   :  { %v488_v25 = vpop.xlane.xlu1 %487 }
 0x248   :  { %978 = vlog2.f32 %v488_v25  ;;  %v678_v25 = vshll.u32 %v677_v41, 16 }
 0x249   :  { %980 = vlog2.f32 %v491_v26 }
 0x24b   :  { %v494_v33 = vpop.xlane.xlu1 %493 }
 0x24c   :  { %982 = vlog2.f32 %v494_v33 }
 0x24d   :  { %v969_v30 = vpop.eup %968  ;;  %984 = vlog2.f32 %v497_v14 }
 0x24e   :  { %v971_v37 = vpop.eup %970  ;;  %v504_v7 = vmul.f32 0.6931472, %v969_v30  ;;  %v386_v30 = vmul.u32 16, %v1345_v8 }
 0x24f   :  { %v502_v17 = vmul.f32 0.6931472, %v971_v37  ;;  %v973_v54 = vpop.eup %972  ;;  %v500_v26 = vpop.xlane.xlu1 %499 }
 0x250   :  { %v522_v13 = vadd.f32 %v504_v7, %v1149_v56  ;;  %v506_v38 = vmul.f32 0.6931472, %v973_v54  ;;  %v692_v56 = vcvt.f32.s32 %v1347_v22  ;;  %v708_v7 = vshll.u32 %v707_v40, 16 }
 0x251   :  { %v975_v52 = vpop.eup %974  ;;  %v521_v32 = vadd.f32 %v502_v17, %v1134_v45  ;;  %v1474_v54 = vshll.u32 %v737_v11, 16  ;;  %986 = vlog2.f32 %v500_v26  ;;  %v1480_v33 = vsub.s32 %v1319_v34, %v386_v30  ;;  %v1621_v26 = vld [vmem:[#allocation11_spill] sm:$0xff] }
 0x252   :  { %v508_v39 = vmul.f32 0.6931472, %v975_v52  ;;  %v582_v61 = vsub.f32 %v522_v13, %v1418_v21  ;;  %v977_v45 = vpop.eup %976  ;;  %v523_v22 = vadd.f32 %v506_v38, %v1132_v44  ;;  %v693_v37 = vshll.u32 %v692_v56, 16 }
 0x253   :  { %v581_v0 = vsub.f32 %v521_v32, %v1424_v42  ;;  %v510_v43 = vmul.f32 0.6931472, %v977_v45  ;;  %v387_v44 = vmul.u32 16, %v1351_v58  ;;  %v388_v56 = vmul.u32 16, %v1368_v48 }
 0x254   :  { %v524_v31 = vadd.f32 %v508_v39, %v1147_v55  ;;  %v592_v42 = vsel %vm402_vm6, %v582_v61, 0.0  ;;  %v583_v59 = vsub.f32 %v523_v22, %v1420_v50  ;;  %v1476_v55 = vshll.u32 %v752_v15, 16 }
 0x255   :  { %v591_v1 = vsel %vm401_vm4, %v581_v0, 0.0  ;;  %v979_v17 = vpop.eup %978  ;;  %v603_v50 = vsel %vm601_vm0, %v592_v42, 0.0  ;;  %v525_v32 = vadd.f32 %v510_v43, %v1170_v6  ;;  %v1488_v41 = vsub.s32 %v1322_v9, %v387_v44 }
 0x256   :  { %v981_v52 = vpop.eup %980  ;;  %v584_v13 = vsub.f32 %v524_v31, %v1422_v2  ;;  %v602_v38 = vsel %vm601_vm0, %v591_v1, 0.0  ;;  %v512_v34 = vmul.f32 0.6931472, %v979_v17  ;;  %v593_v2 = vsel %vm403_vm7, %v583_v59, 0.0 }
 0x257   :  { %v767_v61 = vcvt.f32.s32 %v1398_v19  ;;  %v782_v45 = vcvt.f32.s32 %v1407_v36  ;;  %v604_v6 = vadd.f32 %v603_v50, %v602_v38  ;;  %vm406_vm12 = vcmp.ge.s32.totalorder %v1480_v33, 1 }
 0x258   :  { %v594_v23 = vsel %vm404_vm5, %v584_v13, 0.0  ;;  %v585_v22 = vsub.f32 %v525_v32, %v1426_v53  ;;  %v605_v11 = vsel %vm601_vm0, %v593_v2, 0.0  ;;  %vm407_vm14 = vcmp.ge.s32.totalorder %v1488_v41, 1 }
 0x259   :  { %v983_v9 = vpop.eup %982  ;;  %v526_v53 = vadd.f32 %v512_v34, %v1167_v5  ;;  %v606_v49 = vadd.f32 %v605_v11, %v604_v6  ;;  %v607_v31 = vsel %vm601_vm0, %v594_v23, 0.0  ;;  %v1622_v34 = vld [vmem:[#allocation10_spill] sm:$0xff] }
 0x25a   :  { %v985_v43 = vpop.eup %984  ;;  %v595_v17 = vsel %vm405_vm8, %v585_v22, 0.0  ;;  %v1623_v6 = vld [vmem:[#allocation14_spill] sm:$0xff] }
 0x25b   :  { %v518_v13 = vmul.f32 0.6931472, %v985_v43  ;;  %v608_v50 = vadd.f32 %v607_v31, %v606_v49 }
 0x25e   :  { %v987_v32 = vpop.eup %986 }
 0x2a3   :  { %v660_v21 = vpop.xlane.xlu0 %659 }
 0x2a4   :  { %v661_v29 = vcvt.f32.s32 %v660_v21  ;;  %v1513_v21 = vsub.s32 %v1327_v16, %v388_v56 }
 0x2a6   :  { %v664_v28 = vadd.s32 %v663_v60, %v661_v29  ;;  %v514_v60 = vmul.f32 0.6931472, %v981_v52  ;;  %vm408_vm2 = vcmp.ge.s32.totalorder %v1513_v21, 1 }
 0x2a7   :  { %v690_v20 = vpop.xlane.xlu0 %689  ;;  %v675_v14 = vpop.xlane.xlu1 %674 }
 0x2a8   :  { %vm800_vm9 = vcmp.eq.s32.totalorder %v664_v28, %v1238_v10  ;;  %v691_v24 = vcvt.f32.s32 %v690_v20  ;;  %v676_v39 = vcvt.f32.s32 %v675_v14  ;;  %v527_v29 = vadd.f32 %v514_v60, %v1621_v26 }
 0x2a9   :  { %vm810_vm10 = vmand %vm401_vm4, %vm800_vm9  ;;  %v389_v28 = vmul.u32 16, %v1381_v57  ;;  %v609_v10 = vsel %vm601_vm0, %v595_v17, 0.0 }
 0x2aa   :  { %v694_v40 = vadd.s32 %v693_v37, %v691_v24  ;;  %v679_v0 = vadd.s32 %v678_v25, %v676_v39  ;;  %v516_v37 = vmul.f32 0.6931472, %v983_v9 }
 0x2ab   :  { %v568_v47 = vpop.xlane.xlu1 %567  ;;  %v705_v15 = vpop.xlane.xlu0 %704  ;;  %v1543_v9 = vsub.s32 %v1623_v6, %v389_v28  ;;  %v1626_v28 = vld [vmem:[#allocation12_spill] sm:$0xff] }
 0x2ac   :  { %vm802_vm11 = vcmp.eq.s32.totalorder %v694_v40, %v1269_v63  ;;  %v1620_v63 = vmov 0.0   ;;  %vm801_vm15 = vcmp.eq.s32.totalorder %v679_v0, %v1242_v18  ;;  %v706_v25 = vcvt.f32.s32 %v705_v15 }
 0x2ad   :  { %vm1507_vm13 = vmand %vm403_vm7, %vm802_vm11  ;;  %v820_v30 = vsel %vm810_vm10, 1.0, %v1620_v63  ;;  %v586_v18 = vsub.f32 %v526_v53, %v568_v47  ;;  %v528_v39 = vadd.f32 %v516_v37, %v1622_v34  ;;  %v610_v53 = vadd.f32 %v609_v10, %v608_v50 }
 0x2ae   :  { %vm811_vm1 = vmand %vm402_vm6, %vm801_vm15  ;;  %v822_v42 = vsel %vm1507_vm13, 1.0, %v1620_v63  ;;  %v709_v44 = vadd.s32 %v708_v7, %v706_v25  ;;  %v830_v5 = vsel %vm601_vm0, %v820_v30, 0.0  ;;  %v520_v30 = vmul.f32 0.6931472, %v987_v32 }
 0x2af   :  { %v821_v16 = vsel %vm811_vm1, 1.0, %v1620_v63  ;;  %v571_v27 = vpop.xlane.xlu1 %570  ;;  %v720_v1 = vpop.xlane.xlu0 %719  ;;  %v833_v7 = vsel %vm601_vm0, %v822_v42, 0.0  ;;  %v596_v14 = vsel %vm406_vm12, %v586_v18, 0.0  ;;  %vm409_vm7 = vcmp.ge.s32.totalorder %v1543_v9, 1 }
 0x2b0   :  { %v831_v59 = vsel %vm601_vm0, %v821_v16, 0.0  ;;  %vm803_vm3 = vcmp.eq.s32.totalorder %v709_v44, %v1278_v46  ;;  %v587_v52 = vsub.f32 %v527_v29, %v571_v27  ;;  %v721_v24 = vcvt.f32.s32 %v720_v1  ;;  %v1625_v29 = vld [vmem:[#allocation15_spill] sm:$0xff] }
 0x2b1   :  { %v832_v20 = vadd.f32 %v831_v59, %v830_v5  ;;  %vm813_vm4 = vmand %vm404_vm5, %vm803_vm3  ;;  %v611_v47 = vsel %vm601_vm0, %v596_v14, 0.0  ;;  %v400_v43 = vsub.s32 %v1625_v29, %v390_v35  ;;  %v768_v18 = vshll.u32 %v767_v61, 16 }
 0x2b2   :  { %v823_v56 = vsel %vm813_vm4, 1.0, %v1620_v63  ;;  %v724_v2 = vadd.s32 %v1469_v12, %v721_v24  ;;  %v597_v0 = vsel %vm407_vm14, %v587_v52, 0.0  ;;  %v1624_v12 = vld [vmem:[#allocation13_spill] sm:$0xff]  ;;  %v612_v16 = vadd.f32 %v611_v47, %v610_v53 }
 0x2b3   :  { %v834_v38 = vadd.f32 %v833_v7, %v832_v20  ;;  %v835_v46 = vsel %vm601_vm0, %v823_v56, 0.0  ;;  %v574_v40 = vpop.xlane.xlu1 %573  ;;  %v735_v60 = vpop.xlane.xlu0 %734  ;;  %v529_v15 = vadd.f32 %v518_v13, %v1624_v12  ;;  %v613_v49 = vsel %vm601_vm0, %v597_v0, 0.0 }
 0x2b4   :  { %v588_v22 = vsub.f32 %v528_v39, %v574_v40  ;;  %v736_v11 = vcvt.f32.s32 %v735_v60  ;;  %vm804_vm5 = vcmp.eq.s32.totalorder %v724_v2, %v1296_v4  ;;  %v614_v59 = vadd.f32 %v613_v49, %v612_v16 }
 0x2b5   :  { %v836_v23 = vadd.f32 %v835_v46, %v834_v38  ;;  %vm814_vm6 = vmand %vm405_vm8, %vm804_vm5  ;;  %v530_v17 = vadd.f32 %v520_v30, %v1626_v28  ;;  %vm410_vm10 = vcmp.ge.s32.totalorder %v400_v43, 1  ;;  %v783_v14 = vshll.u32 %v782_v45, 16 }
 0x2b6   :  { %v598_v25 = vsel %vm408_vm2, %v588_v22, 0.0  ;;  %v739_v37 = vadd.s32 %v1474_v54, %v736_v11  ;;  %v824_v31 = vsel %vm814_vm6, 1.0, %v1620_v63 }
 0x2b7   :  { %v577_v26 = vpop.xlane.xlu1 %576  ;;  %v750_v4 = vpop.xlane.xlu0 %749  ;;  %v837_v42 = vsel %vm601_vm0, %v824_v31, 0.0  ;;  %v615_v44 = vsel %vm601_vm0, %v598_v25, 0.0 }
 0x2b8   :  { %vm805_vm8 = vcmp.eq.s32.totalorder %v739_v37, %v1345_v8  ;;  %v589_v51 = vsub.f32 %v529_v15, %v577_v26  ;;  %v838_v54 = vadd.f32 %v837_v42, %v836_v23  ;;  %v751_v5 = vcvt.f32.s32 %v750_v4 }
 0x2b9   :  { %vm815_vm9 = vmand %vm406_vm12, %vm805_vm8  ;;  %v616_v33 = vadd.f32 %v615_v44, %v614_v59 }
 0x2ba   :  { %v825_v27 = vsel %vm815_vm9, 1.0, %v1620_v63  ;;  %v599_v1 = vsel %vm409_vm7, %v589_v51, 0.0  ;;  %v754_v61 = vadd.s32 %v1476_v55, %v751_v5  ;;  %v797_v55 = vcvt.f32.s32 %v1413_v3 }
 0x2bb   :  { %v839_v8 = vsel %vm601_vm0, %v825_v27, 0.0  ;;  %v617_v19 = vsel %vm601_vm0, %v599_v1, 0.0  ;;  %v580_v20 = vpop.xlane.xlu1 %579  ;;  %v765_v52 = vpop.xlane.xlu0 %764 }
 0x2bc   :  { %v840_v13 = vadd.f32 %v839_v8, %v838_v54  ;;  %v590_v7 = vsub.f32 %v530_v17, %v580_v20  ;;  %v766_v50 = vcvt.f32.s32 %v765_v52  ;;  %vm806_vm11 = vcmp.eq.s32.totalorder %v754_v61, %v1351_v58 }
 0x2bd   :  { %vm816_vm12 = vmand %vm407_vm14, %vm806_vm11  ;;  %v618_v38 = vadd.f32 %v617_v19, %v616_v33  ;;  %v798_v60 = vshll.u32 %v797_v55, 16 }
 0x2be   :  { %v600_v24 = vsel %vm410_vm10, %v590_v7, 0.0  ;;  %v769_v32 = vadd.s32 %v768_v18, %v766_v50  ;;  %v826_v56 = vsel %vm816_vm12, 1.0, %v1620_v63 }
 0x2bf   :  { %v780_v34 = vpop.xlane.xlu0 %779  ;;  %v619_v39 = vsel %vm601_vm0, %v600_v24, 0.0  ;;  %v841_v46 = vsel %vm601_vm0, %v826_v56, 0.0 }
 0x2c0   :  { %vm807_vm13 = vcmp.eq.s32.totalorder %v769_v32, %v1368_v48  ;;  %v781_v58 = vcvt.f32.s32 %v780_v34  ;;  %v620_v41 = vadd.f32 %v619_v39, %v618_v38  ;;  %v842_v2 = vadd.f32 %v841_v46, %v840_v13 }
 0x2c1   :  { %vm817_vm14 = vmand %vm408_vm2, %vm807_vm13 }
 0x2c2   :  { %v827_v36 = vsel %vm817_vm14, 1.0, %v1620_v63  ;;  %v784_v45 = vadd.s32 %v783_v14, %v781_v58  ;;  %621 = vadd.xlane.f32.xlu0 %v620_v41 }
 0x2c3   :  { %v795_v3 = vpop.xlane.xlu0 %794  ;;  %v843_v40 = vsel %vm601_vm0, %v827_v36, 0.0 }
 0x2c4   :  { %vm808_vm15 = vcmp.eq.s32.totalorder %v784_v45, %v1381_v57  ;;  %v796_v6 = vcvt.f32.s32 %v795_v3  ;;  %v844_v35 = vadd.f32 %v843_v40, %v842_v2 }
 0x2c5   :  { %vm818_vm1 = vmand %vm409_vm7, %vm808_vm15 }
 0x2c6   :  { %v799_v48 = vadd.s32 %v798_v60, %v796_v6  ;;  %v828_v21 = vsel %vm818_vm1, 1.0, %v1620_v63 }
 0x2c7   :  { %v845_v23 = vsel %vm601_vm0, %v828_v21, 0.0 }
 0x2c8   :  { %vm809_vm2 = vcmp.eq.s32.totalorder %v799_v48, %v1392_v62  ;;  %v846_v0 = vadd.f32 %v845_v23, %v844_v35 }
 0x2c9   :  { %vm819_vm3 = vmand %vm410_vm10, %vm809_vm2 }
 0x2ca   :  { %v829_v22 = vsel %vm819_vm3, 1.0, %v1620_v63 }
 0x2cb   :  { %v847_v11 = vsel %vm601_vm0, %v829_v22, 0.0 }
 0x2cc   :  { %v848_v57 = vadd.f32 %v847_v11, %v846_v0 }
 0x2ce   :  { %849 = vadd.xlane.f32.xlu1 %v848_v57 }
 0x34b   :  { %v622_v10 = vpop.xlane.xlu0 %621 }
 0x34c   :  { %v623_v47 = vrot.slane %v622_v10, 4 }
 0x34e   :  { %v624_v9 = vadd.f32 %v623_v47, %v622_v10 }
 0x350   :  { %v625_v12 = vrot.slane %v624_v9, 2 }
 0x352   :  { %v626_v15 = vadd.f32 %v625_v12, %v624_v9 }
 0x354   :  { %v627_v30 = vrot.slane %v626_v15, 1 }
 0x356   :  { %v628_v53 = vadd.f32 %v627_v30, %v626_v15 }
 0x357   :  { %v850_v25 = vpop.xlane.xlu1 %849 }
 0x358   :  { %v851_v37 = vrot.slane %v850_v25, 4  ;;  %938 = vpush %v628_v53 }
 0x35a   :  { %v852_v62 = vadd.f32 %v851_v37, %v850_v25 }
 0x35c   :  { %v853_v49 = vrot.slane %v852_v62, 2 }
 0x35e   :  { %v854_v31 = vadd.f32 %v853_v49, %v852_v62 }
 0x360   :  { %v855_v26 = vrot.slane %v854_v31, 1 }
 0x362   :  { %v856_v4 = vadd.f32 %v855_v26, %v854_v31 }
 0x364   :  { %940 = vpush %v856_v4 }
 0x389   :  { %s939_s0 = spop %938 }
 0x38a   :  { %s858_s13 = smul.f32 0.013333334, %s939_s0 }
 0x38c   :  { %s859_s14 = smul.f32 0.5, %s858_s13  ;;  %863 = sst [smem:[#allocation7 + $0x1]] %s858_s13 }
 0x38e   :  { %861 = sst [smem:[#allocation7]] %s859_s14 }
 0x395   :  { %s941_s15 = spop %940 }
 0x396   :  { %s864_s16 = smul.f32 0.013333334, %s941_s15 }
 0x398   :  { %866 = sst [smem:[#allocation7 + $0x2]] %s864_s16 }
 0x399   :  { %874 = dma.smem_to_hbm %s1025_s17, 16, %s1603_s1, [#allocation6]  }
 0x39a   :  { %1018 = dma.done.wait [#allocation6], 16  }
 0x39b   :  { %1019 = vsyncadd [#allocation6], 4294967280 }
 0x39c   :  { %878 = sfence }
 0x39d   :  { %879 = vsyncpa [#allocation5], 1 }
 0x39e   :  { %880 = vsyncpa [#allocation6], 1 }

</bundles_post_ra>
